<compile_context>
chip_gen: v7x
topology: tpu7x:2x2x1
jax: 0.10.0
libtpu: 0.0.40
codegen_flags: <defaults>
</compile_context>

<pallas_src>
import numpy as np
import jax
import jax.numpy as jnp
from jax import lax
from jax.experimental import pallas as pl
from jax.experimental.pallas import tpu as pltpu

_VMEM_LIMIT = 32 * 1024 * 1024    # scoped-VMEM request; safe on v5e/v6e/v7x

# Color-conversion constants (match the PyTorch module).
_CR_R = 1.402
_CB_G = 0.344136286
_CR_G = 0.714136286
_CB_B = 1.772


# ----------------------------------------------------------------------------
# Constant weights (mirror IBWDCT.__init__)
# ----------------------------------------------------------------------------
def _dct_basis():
    idx = np.arange(8)
    a = np.cos(np.pi * (2 * idx[None, :] + 1) * idx[:, None] / 16.0)
    alpha = np.where(idx == 0, np.sqrt(1.0 / 8.0), 0.5)
    return a * alpha[:, None]                       # A[p, m]


def _hi_lo(m):
    """Split an f32 matrix into bf16 (hi, lo) with hi + lo ~= m (3-pass matmul)."""
    m = jnp.asarray(m, jnp.float32)
    hi = m.astype(jnp.bfloat16)
    lo = (m - hi.astype(jnp.float32)).astype(jnp.bfloat16)
    return hi, lo


def make_decoder_params():
    A = _dct_basis()
    # W[p*8+q, m*8+n]: coefficient (p,q) -> pixel (m,n) within an 8x8 block.
    W = np.einsum("pm,qn->pqmn", A, A).reshape(64, 64)
    # Weights-on-the-left orientation: pixels = W.T @ coefficients.
    wt_hi, wt_lo = _hi_lo(W.T)                      # (pixel, coef), bf16 hi/lo
    return {"wt_hi": wt_hi, "wt_lo": wt_lo,
            "w_ref": jnp.asarray(W, jnp.float32)}   # f32 weight for the reference


# ----------------------------------------------------------------------------
# Pallas kernels (channels on sublanes, pixels on lanes)
# ----------------------------------------------------------------------------
def _split_bf16(x):
    hi = x.astype(jnp.bfloat16)
    lo = (x - hi.astype(jnp.float32)).astype(jnp.bfloat16)
    return hi, lo


def _dot3(w_hi, w_lo, x):
    """(bf16 hi + bf16 lo) @ f32: three bf16 MXU passes with f32 accumulation.
    # TODO(synk): a 2-pass variant (drop the w_lo term) is a further v5e-only
    # option behind a tolerance sign-off; not needed now that the kernel is
    # memory-bound on all generations."""
    x_hi, x_lo = _split_bf16(x)
    acc = jnp.dot(w_hi, x_hi, preferred_element_type=jnp.float32)
    acc = acc + jnp.dot(w_lo, x_hi, preferred_element_type=jnp.float32)
    acc = acc + jnp.dot(w_hi, x_lo, preferred_element_type=jnp.float32)
    return acc


def _idct_kernel(x_ref, wh_ref, wl_ref, o_ref):
    # (64, T) coefficients -> (64, T) block pixels (pixel index = m*8+n).
    o_ref[...] = _dot3(wh_ref[...], wl_ref[...], x_ref[...]).astype(o_ref.dtype)


def _idct_center_kernel(c_ref, wh_ref, wl_ref, o_ref):
    # [Cb|Cr] coefficients (128, T) -> centered [Cb|Cr] block pixels (128, T).
    w_hi = wh_ref[...]
    w_lo = wl_ref[...]
    o_ref[0:64, :] = (_dot3(w_hi, w_lo, c_ref[0:64, :]) - 0.5).astype(o_ref.dtype)
    o_ref[64:128, :] = (_dot3(w_hi, w_lo, c_ref[64:128, :]) - 0.5).astype(o_ref.dtype)


def _fused_rgb_kernel(y_ref, c_ref, wh_ref, wl_ref, o_ref):
    # Three small IDCT matmuls (MXU) + YCbCr->RGB affine map (VPU, free slots).
    w_hi = wh_ref[...]
    w_lo = wl_ref[...]
    py = _dot3(w_hi, w_lo, y_ref[...])                       # (64, T)
    pcb = _dot3(w_hi, w_lo, c_ref[0:64, :]) - 0.5
    pcr = _dot3(w_hi, w_lo, c_ref[64:128, :]) - 0.5
    o_ref[0:64, :] = (py + _CR_R * pcr).astype(o_ref.dtype)
    o_ref[64:128, :] = (py - _CB_G * pcb - _CR_G * pcr).astype(o_ref.dtype)
    o_ref[128:192, :] = (py + _CB_B * pcb).astype(o_ref.dtype)


# ----------------------------------------------------------------------------
# pallas_call driver over (batch, lane-tile) grid
# ----------------------------------------------------------------------------
def _pick_tile(hw, target_tiles=8, min_tile=256, max_tile=2048):
    """Adaptive lane tile: full width for small images; 256..2048 lanes and
    ~target_tiles steps per batch for large ones (several pipelined grid steps
    per TensorCore on v7x, while staying well inside VMEM)."""
    if hw <= min_tile:
        return hw
    t = 128 * max(1, (hw // target_tiles) // 128)
    return int(min(max_tile, max(min_tile, t), hw))


def _run_lane_tiles(kernel, ins, consts, out_chan, out_dtype):
    """ins: list of (B, C_i, HW) arrays (free reshapes of NCHW coefficient
    tensors); consts: small 2-D constant weights.  Grid = (B, lane-tiles)."""
    B, _, hw = ins[0].shape
    hw_p = max(hw, 128)                 # tiny inputs only: pad to one vreg width
    if hw_p != hw:
        ins = [jnp.pad(a, ((0, 0), (0, 0), (0, hw_p - hw))) for a in ins]
    t = _pick_tile(hw_p)
    nt = -(-hw_p // t)
    in_specs = [pl.BlockSpec((None, a.shape[1], t), lambda b, i: (b, 0, i))
                for a in ins]
    in_specs += [pl.BlockSpec(c.shape, lambda b, i: (0, 0)) for c in consts]
    out = pl.pallas_call(
        kernel,
        out_shape=jax.ShapeDtypeStruct((B, out_chan, hw_p), out_dtype),
        grid=(B, nt),
        in_specs=in_specs,
        out_specs=pl.BlockSpec((None, out_chan, t), lambda b, i: (b, 0, i)),
        compiler_params=pltpu.CompilerParams(
            dimension_semantics=("parallel", "parallel"),
            vmem_limit_bytes=_VMEM_LIMIT),
    )(*ins, *consts)
    return out[:, :, :hw] if hw_p != hw else out


# ----------------------------------------------------------------------------
# Output layout glue (the only remaining layout pass)
# ----------------------------------------------------------------------------
def _channels_to_image(out, B, H, W, n_colors):
    # (B, n_colors*64, H*W), channel = color*64 + m*8 + n  ->  (B, n_colors, 8H, 8W)
    # TODO(synk): this single depth-to-space transpose stays in XLA (review
    # option b); the input-side transposes of the previous version are gone.
    x = out.reshape(B, n_colors, 8, 8, H, W)
    x = x.transpose(0, 1, 4, 2, 5, 3)
    return x.reshape(B, n_colors, 8 * H, 8 * W)


# ----------------------------------------------------------------------------
# Align-corners x2 bilinear upsample as two small interpolation matmuls
# ----------------------------------------------------------------------------
def _upsample_matrix(n_in):
    n_out = 2 * n_in
    pos = np.arange(n_out) * ((n_in - 1) / (n_out - 1))
    lo = np.floor(pos).astype(np.int64)
    hi = np.minimum(lo + 1, n_in - 1)
    frac = pos - lo
    M = np.zeros((n_out, n_in), dtype=np.float64)
    M[np.arange(n_out), lo] += 1.0 - frac
    M[np.arange(n_out), hi] += frac
    return jnp.asarray(M, jnp.float32)


def _upsample2x_align_corners(x):
    # nn.UpsamplingBilinear2d(scale_factor=2) == bilinear, align_corners=True.
    # Precision dropped HIGHEST (6-pass) -> HIGH (3-pass) per the review.
    _, _, h, w = x.shape
    mr = _upsample_matrix(h)
    mc = _upsample_matrix(w)
    x = jnp.einsum("oh,bchw->bcow", mr, x, precision=lax.Precision.HIGH)
    x = jnp.einsum("pw,bchw->bchp", mc, x, precision=lax.Precision.HIGH)
    return x


# ----------------------------------------------------------------------------
# Public ops
# ----------------------------------------------------------------------------
def ibwdct(x, params, *, out_dtype=jnp.float32):
    """Inverse blockwise DCT: (B, 64, H, W) -> (B, 1, 8H, 8W)."""
    B, _, H, W = x.shape
    x3 = x.reshape(B, 64, H * W)                    # free reshape of NCHW
    out = _run_lane_tiles(_idct_kernel, [x3],
                          [params["wt_hi"], params["wt_lo"]], 64, out_dtype)
    return _channels_to_image(out, B, H, W, 1)


def jpeg_decode(y_coef, cbcr_coef, params, *, out_dtype=jnp.float32):
    """JPEGDecoder.forward((y, cbcr))."""
    if cbcr_coef is None:
        return ibwdct(y_coef, params, out_dtype=out_dtype)

    B, _, H, W = y_coef.shape
    _, _, Hc, Wc = cbcr_coef.shape

    if (Hc, Wc) == (H, W):
        # Fully fused path: one kernel does the three IDCTs and the YCbCr->RGB
        # affine map, emitting 192 = [R|G|B] block channels per pixel tile.
        y3 = y_coef.reshape(B, 64, H * W)
        c3 = cbcr_coef.reshape(B, 128, H * W)
        out = _run_lane_tiles(_fused_rgb_kernel, [y3, c3],
                              [params["wt_hi"], params["wt_lo"]], 192, out_dtype)
        return _channels_to_image(out, B, H, W, 3)

    # Chroma-subsampled path: Pallas IDCTs (with -0.5 folded in for chroma),
    # matrix-form x2 align-corners upsample, single fused color combine.
    y_img = ibwdct(y_coef, params, out_dtype=jnp.float32)       # (B, 1, 8H, 8W)
    c3 = cbcr_coef.reshape(B, 128, Hc * Wc)
    cc = _run_lane_tiles(_idct_center_kernel, [c3],
                         [params["wt_hi"], params["wt_lo"]], 128, jnp.float32)
    cbcr_img = _channels_to_image(cc, B, Hc, Wc, 2)             # centered Cb, Cr
    cbcr_img = _upsample2x_align_corners(cbcr_img)
    cb = cbcr_img[:, 0:1]
    cr = cbcr_img[:, 1:2]
    # TODO(synk): the x2 upsample + this combine could become a second small
    # Pallas kernel (constant interpolation matrices); currently the combine is
    # one fused XLA elementwise pass.
    rgb = jnp.concatenate([y_img + _CR_R * cr,
                           y_img - _CB_G * cb - _CR_G * cr,
                           y_img + _CB_B * cb], axis=1)
    return rgb.astype(out_dtype)


# ----------------------------------------------------------------------------
# Pure-JAX reference (mirrors the PyTorch module math) for verification
# ----------------------------------------------------------------------------
def _reference_idct(x, w64):
    B, _, H, W = x.shape
    blk = jnp.einsum("bchw,ck->bhwk", x, w64, precision=lax.Precision.HIGHEST)
    return (blk.reshape(B, H, W, 8, 8).transpose(0, 1, 3, 2, 4)
               .reshape(B, 1, 8 * H, 8 * W))


def _reference_upsample(x):
    def resize_axis(arr, axis, in_size):
        out_size = 2 * in_size
        pos = jnp.arange(out_size) * ((in_size - 1) / (out_size - 1))
        lo = jnp.floor(pos).astype(jnp.int32)
        hi = jnp.minimum(lo + 1, in_size - 1)
        frac = (pos - lo).astype(arr.dtype)
        a = jnp.take(arr, lo, axis=axis)
        b = jnp.take(arr, hi, axis=axis)
        shape = [1] * arr.ndim
        shape[axis] = out_size
        frac = frac.reshape(shape)
        return a * (1 - frac) + b * frac

    x = resize_axis(x, 2, x.shape[2])
    x = resize_axis(x, 3, x.shape[3])
    return x


def _reference_decode(y_coef, cbcr_coef, w64):
    y = _reference_idct(y_coef, w64)
    if cbcr_coef is None:
        return y
    cbcr = jnp.concatenate([_reference_idct(cbcr_coef[:, :64], w64),
                            _reference_idct(cbcr_coef[:, 64:], w64)], axis=1)
    if cbcr.shape[2:] != y.shape[2:]:
        cbcr = _reference_upsample(cbcr)
    cb = cbcr[:, 0:1] - 0.5
    cr = cbcr[:, 1:2] - 0.5
    return jnp.concatenate([y + _CR_R * cr,
                            y - _CB_G * cb - _CR_G * cr,
                            y + _CB_B * cb], axis=1)


# ----------------------------------------------------------------------------
if __name__ == "__main__":
    params = make_decoder_params()
    decode = jax.jit(jpeg_decode, static_argnames=("out_dtype",))

    def check(name, out, ref, rel_tol):
        out = jax.block_until_ready(out)
        err = float(jnp.max(jnp.abs(out.astype(jnp.float32) - ref)))
        scale = float(jnp.maximum(1.0, jnp.max(jnp.abs(ref))))
        assert err <= rel_tol * scale, f"{name}: err={err:.3e} scale={scale:.3e}"

    key = jax.random.PRNGKey(0)
    k1, k2, k3 = jax.random.split(key, 3)
    B, H, W = 2, 4, 4
    y_coef = jax.random.normal(k1, (B, 64, H, W), dtype=jnp.float32)
    cbcr_coef = jax.random.normal(k2, (B, 128, H, W), dtype=jnp.float32)

    # Fused path (chroma at luma resolution), f32 output.
    out = decode(y_coef, cbcr_coef, params, out_dtype=jnp.float32)
    assert out.shape == (B, 3, 8 * H, 8 * W), out.shape
    ref = jax.block_until_ready(
        _reference_decode(y_coef, cbcr_coef, params["w_ref"]))
    # Tolerance 1e-3 (relative to max |ref|): kernel matmuls use a 3-pass bf16
    # hi/lo split with f32 accumulation instead of 6-pass f32 HIGHEST.
    check("fused_f32", out, ref, 1e-3)

    # Fused path, bf16 output (recommended on v6e/v7x: ~2x fewer output bytes).
    # Tolerance widened for the bf16 output quantization (~2^-8 relative).
    out_bf16 = decode(y_coef, cbcr_coef, params, out_dtype=jnp.bfloat16)
    assert out_bf16.dtype == jnp.bfloat16
    check("fused_bf16", out_bf16, ref, 1e-2)

    # Luma-only path (cbcr=None).
    y_only = decode(y_coef, None, params, out_dtype=jnp.float32)
    assert y_only.shape == (B, 1, 8 * H, 8 * W), y_only.shape
    y_ref = _reference_decode(y_coef, None, params["w_ref"])
    check("luma", y_only, y_ref, 1e-3)

    # Chroma-subsampled path (x2 align-corners upsample).
    cbcr_small = jax.random.normal(k3, (B, 128, H // 2, W // 2),
                                   dtype=jnp.float32)
    out2 = decode(y_coef, cbcr_small, params, out_dtype=jnp.float32)
    assert out2.shape == (B, 3, 8 * H, 8 * W), out2.shape
    ref2 = _reference_decode(y_coef, cbcr_small, params["w_ref"])
    check("subsampled", out2, ref2, 1e-3)

    print("KERNEL_OK")
</pallas_src>

<mosaic_0001>
module attributes {stable_mosaic.version = 11 : i64} {
  func.func @_fused_rgb_kernel(%arg0: i32, %arg1: i32, %arg2: memref<1x64x128xf32, #tpu.memory_space<vmem>>, %arg3: memref<1x128x128xf32, #tpu.memory_space<vmem>>, %arg4: memref<64x64xbf16, #tpu.memory_space<vmem>>, %arg5: memref<64x64xbf16, #tpu.memory_space<vmem>>, %arg6: memref<1x192x128xf32, #tpu.memory_space<vmem>>) attributes {dimension_semantics = [#tpu.dimension_semantics<parallel>, #tpu.dimension_semantics<parallel>], iteration_bounds = array<i64: 2, 1>, scalar_prefetch = 0 : i64, scratch_operands = 0 : i64, tpu.core_type = #tpu.core_type<tc>, window_params = [{transform_indices = @transform_0, window_bounds = array<i64: 1, 64, 128>}, {transform_indices = @transform_1, window_bounds = array<i64: 1, 128, 128>}, {pipeline_mode = #tpu.pipeline_mode<synchronous>, transform_indices = @transform_2, window_bounds = array<i64: 64, 64>}, {pipeline_mode = #tpu.pipeline_mode<synchronous>, transform_indices = @transform_3, window_bounds = array<i64: 64, 64>}, {transform_indices = @transform_4, window_bounds = array<i64: 1, 192, 128>}]} {
    %c0 = arith.constant 0 : index
    %c0_0 = arith.constant 0 : index
    %0 = vector.load %arg4[%c0, %c0_0] : memref<64x64xbf16, #tpu.memory_space<vmem>>, vector<64x64xbf16>
    %c0_1 = arith.constant 0 : index
    %c0_2 = arith.constant 0 : index
    %1 = vector.load %arg5[%c0_1, %c0_2] : memref<64x64xbf16, #tpu.memory_space<vmem>>, vector<64x64xbf16>
    %c0_3 = arith.constant 0 : index
    %c0_4 = arith.constant 0 : index
    %c0_5 = arith.constant 0 : index
    %2 = vector.load %arg2[%c0_3, %c0_4, %c0_5] : memref<1x64x128xf32, #tpu.memory_space<vmem>>, vector<1x64x128xf32>
    %3 = vector.shape_cast %2 : vector<1x64x128xf32> to vector<64x128xf32>
    %4 = arith.truncf %3 : vector<64x128xf32> to vector<64x128xbf16>
    %5 = arith.extf %4 : vector<64x128xbf16> to vector<64x128xf32>
    %6 = arith.subf %3, %5 : vector<64x128xf32>
    %7 = arith.truncf %6 : vector<64x128xf32> to vector<64x128xbf16>
    %cst = arith.constant dense<0.000000e+00> : vector<64x128xf32>
    %8 = tpu.matmul %0, %4, %cst {dimension_numbers = #tpu.dot_dimension_numbers<[1], [0], [0], [1], [0, 0, 1, 1], [], []>} : vector<64x64xbf16>, vector<64x128xbf16>, vector<64x128xf32> -> vector<64x128xf32>
    %cst_6 = arith.constant dense<0.000000e+00> : vector<64x128xf32>
    %9 = tpu.matmul %1, %4, %cst_6 {dimension_numbers = #tpu.dot_dimension_numbers<[1], [0], [0], [1], [0, 0, 1, 1], [], []>} : vector<64x64xbf16>, vector<64x128xbf16>, vector<64x128xf32> -> vector<64x128xf32>
    %10 = arith.addf %8, %9 : vector<64x128xf32>
    %cst_7 = arith.constant dense<0.000000e+00> : vector<64x128xf32>
    %11 = tpu.matmul %0, %7, %cst_7 {dimension_numbers = #tpu.dot_dimension_numbers<[1], [0], [0], [1], [0, 0, 1, 1], [], []>} : vector<64x64xbf16>, vector<64x128xbf16>, vector<64x128xf32> -> vector<64x128xf32>
    %12 = arith.addf %10, %11 : vector<64x128xf32>
    %c0_8 = arith.constant 0 : index
    %c0_9 = arith.constant 0 : index
    %c0_10 = arith.constant 0 : index
    %13 = vector.load %arg3[%c0_8, %c0_9, %c0_10] : memref<1x128x128xf32, #tpu.memory_space<vmem>>, vector<1x64x128xf32>
    %14 = vector.shape_cast %13 : vector<1x64x128xf32> to vector<64x128xf32>
    %15 = arith.truncf %14 : vector<64x128xf32> to vector<64x128xbf16>
    %16 = arith.extf %15 : vector<64x128xbf16> to vector<64x128xf32>
    %17 = arith.subf %14, %16 : vector<64x128xf32>
    %18 = arith.truncf %17 : vector<64x128xf32> to vector<64x128xbf16>
    %cst_11 = arith.constant dense<0.000000e+00> : vector<64x128xf32>
    %19 = tpu.matmul %0, %15, %cst_11 {dimension_numbers = #tpu.dot_dimension_numbers<[1], [0], [0], [1], [0, 0, 1, 1], [], []>} : vector<64x64xbf16>, vector<64x128xbf16>, vector<64x128xf32> -> vector<64x128xf32>
    %cst_12 = arith.constant dense<0.000000e+00> : vector<64x128xf32>
    %20 = tpu.matmul %1, %15, %cst_12 {dimension_numbers = #tpu.dot_dimension_numbers<[1], [0], [0], [1], [0, 0, 1, 1], [], []>} : vector<64x64xbf16>, vector<64x128xbf16>, vector<64x128xf32> -> vector<64x128xf32>
    %21 = arith.addf %19, %20 : vector<64x128xf32>
    %cst_13 = arith.constant dense<0.000000e+00> : vector<64x128xf32>
    %22 = tpu.matmul %0, %18, %cst_13 {dimension_numbers = #tpu.dot_dimension_numbers<[1], [0], [0], [1], [0, 0, 1, 1], [], []>} : vector<64x64xbf16>, vector<64x128xbf16>, vector<64x128xf32> -> vector<64x128xf32>
    %23 = arith.addf %21, %22 : vector<64x128xf32>
    %cst_14 = arith.constant 5.000000e-01 : f32
    %24 = vector.broadcast %cst_14 : f32 to vector<64x128xf32>
    %25 = arith.subf %23, %24 : vector<64x128xf32>
    %c0_15 = arith.constant 0 : index
    %c64 = arith.constant 64 : index
    %c0_16 = arith.constant 0 : index
    %26 = vector.load %arg3[%c0_15, %c64, %c0_16] : memref<1x128x128xf32, #tpu.memory_space<vmem>>, vector<1x64x128xf32>
    %27 = vector.shape_cast %26 : vector<1x64x128xf32> to vector<64x128xf32>
    %28 = arith.truncf %27 : vector<64x128xf32> to vector<64x128xbf16>
    %29 = arith.extf %28 : vector<64x128xbf16> to vector<64x128xf32>
    %30 = arith.subf %27, %29 : vector<64x128xf32>
    %31 = arith.truncf %30 : vector<64x128xf32> to vector<64x128xbf16>
    %cst_17 = arith.constant dense<0.000000e+00> : vector<64x128xf32>
    %32 = tpu.matmul %0, %28, %cst_17 {dimension_numbers = #tpu.dot_dimension_numbers<[1], [0], [0], [1], [0, 0, 1, 1], [], []>} : vector<64x64xbf16>, vector<64x128xbf16>, vector<64x128xf32> -> vector<64x128xf32>
    %cst_18 = arith.constant dense<0.000000e+00> : vector<64x128xf32>
    %33 = tpu.matmul %1, %28, %cst_18 {dimension_numbers = #tpu.dot_dimension_numbers<[1], [0], [0], [1], [0, 0, 1, 1], [], []>} : vector<64x64xbf16>, vector<64x128xbf16>, vector<64x128xf32> -> vector<64x128xf32>
    %34 = arith.addf %32, %33 : vector<64x128xf32>
    %cst_19 = arith.constant dense<0.000000e+00> : vector<64x128xf32>
    %35 = tpu.matmul %0, %31, %cst_19 {dimension_numbers = #tpu.dot_dimension_numbers<[1], [0], [0], [1], [0, 0, 1, 1], [], []>} : vector<64x64xbf16>, vector<64x128xbf16>, vector<64x128xf32> -> vector<64x128xf32>
    %36 = arith.addf %34, %35 : vector<64x128xf32>
    %cst_20 = arith.constant 5.000000e-01 : f32
    %37 = vector.broadcast %cst_20 : f32 to vector<64x128xf32>
    %38 = arith.subf %36, %37 : vector<64x128xf32>
    %cst_21 = arith.constant 1.402000e+00 : f32
    %39 = vector.broadcast %cst_21 : f32 to vector<64x128xf32>
    %40 = arith.mulf %39, %38 : vector<64x128xf32>
    %41 = arith.addf %12, %40 : vector<64x128xf32>
    %c0_22 = arith.constant 0 : index
    %c0_23 = arith.constant 0 : index
    %c0_24 = arith.constant 0 : index
    %42 = vector.load %arg6[%c0_22, %c0_23, %c0_24] : memref<1x192x128xf32, #tpu.memory_space<vmem>>, vector<1x64x128xf32>
    %43 = vector.shape_cast %42 : vector<1x64x128xf32> to vector<64x128xf32>
    %44 = vector.shape_cast %41 : vector<64x128xf32> to vector<1x64x128xf32>
    tpu.vector_store %arg6[%c0_22, %c0_23, %c0_24], %44 {strides = array<i32>} : memref<1x192x128xf32, #tpu.memory_space<vmem>>, vector<1x64x128xf32>,
    %cst_25 = arith.constant 0.344136298 : f32
    %45 = vector.broadcast %cst_25 : f32 to vector<64x128xf32>
    %46 = arith.mulf %45, %25 : vector<64x128xf32>
    %47 = arith.subf %12, %46 : vector<64x128xf32>
    %cst_26 = arith.constant 0.714136302 : f32
    %48 = vector.broadcast %cst_26 : f32 to vector<64x128xf32>
    %49 = arith.mulf %48, %38 : vector<64x128xf32>
    %50 = arith.subf %47, %49 : vector<64x128xf32>
    %c0_27 = arith.constant 0 : index
    %c64_28 = arith.constant 64 : index
    %c0_29 = arith.constant 0 : index
    %51 = vector.load %arg6[%c0_27, %c64_28, %c0_29] : memref<1x192x128xf32, #tpu.memory_space<vmem>>, vector<1x64x128xf32>
    %52 = vector.shape_cast %51 : vector<1x64x128xf32> to vector<64x128xf32>
    %53 = vector.shape_cast %50 : vector<64x128xf32> to vector<1x64x128xf32>
    tpu.vector_store %arg6[%c0_27, %c64_28, %c0_29], %53 {strides = array<i32>} : memref<1x192x128xf32, #tpu.memory_space<vmem>>, vector<1x64x128xf32>,
    %cst_30 = arith.constant 1.772000e+00 : f32
    %54 = vector.broadcast %cst_30 : f32 to vector<64x128xf32>
    %55 = arith.mulf %54, %25 : vector<64x128xf32>
    %56 = arith.addf %12, %55 : vector<64x128xf32>
    %c0_31 = arith.constant 0 : index
    %c128 = arith.constant 128 : index
    %c0_32 = arith.constant 0 : index
    %57 = vector.load %arg6[%c0_31, %c128, %c0_32] : memref<1x192x128xf32, #tpu.memory_space<vmem>>, vector<1x64x128xf32>
    %58 = vector.shape_cast %57 : vector<1x64x128xf32> to vector<64x128xf32>
    %59 = vector.shape_cast %56 : vector<64x128xf32> to vector<1x64x128xf32>
    tpu.vector_store %arg6[%c0_31, %c128, %c0_32], %59 {strides = array<i32>} : memref<1x192x128xf32, #tpu.memory_space<vmem>>, vector<1x64x128xf32>,
    return
  }
  func.func @transform_0(%arg0: i32, %arg1: i32) -> (i32, i32, i32) {
    %c0_i32 = arith.constant 0 : i32
    %c0_i32_0 = arith.constant 0 : i32
    return %arg0, %c0_i32, %arg1 : i32, i32, i32
  }
  func.func @transform_1(%arg0: i32, %arg1: i32) -> (i32, i32, i32) {
    %c0_i32 = arith.constant 0 : i32
    %c0_i32_0 = arith.constant 0 : i32
    return %arg0, %c0_i32, %arg1 : i32, i32, i32
  }
  func.func @transform_2(%arg0: i32, %arg1: i32) -> (i32, i32) {
    %c0_i32 = arith.constant 0 : i32
    %c0_i32_0 = arith.constant 0 : i32
    %c0_i32_1 = arith.constant 0 : i32
    return %c0_i32, %c0_i32_0 : i32, i32
  }
  func.func @transform_3(%arg0: i32, %arg1: i32) -> (i32, i32) {
    %c0_i32 = arith.constant 0 : i32
    %c0_i32_0 = arith.constant 0 : i32
    %c0_i32_1 = arith.constant 0 : i32
    return %c0_i32, %c0_i32_0 : i32, i32
  }
  func.func @transform_4(%arg0: i32, %arg1: i32) -> (i32, i32, i32) {
    %c0_i32 = arith.constant 0 : i32
    %c0_i32_0 = arith.constant 0 : i32
    return %arg0, %c0_i32, %arg1 : i32, i32, i32
  }
}

</mosaic_0001>

<bundles_post_ra>
// kernel: jpeg_decode.1
= control target key start
LH: loop header
LB: loop body
LE: loop exit
PB: predicated region body
PF: predicated region fallthrough
CT: control target
= control target key end

     0   :  { %s1680_s15 = smov 0   ;;  %s1682_s16 = smov 0   ;;  %s2078_s0 = inlined_call_operand.vmem [shape: f32[2,64,128], index: 0, kind: input, shape index: {}]   ;;  %s2079_s1 = inlined_call_operand.vmem [shape: f32[2,128,128], index: 1, kind: input, shape index: {}]   ;;  %s2080_s2 = inlined_call_operand.vmem [shape: bf16[64,64], index: 2, kind: input, shape index: {}]   ;;  %s2081_s3 = inlined_call_operand.vmem [shape: bf16[64,64], index: 3, kind: input, shape index: {}]   ;;  %s2082_s4 = inlined_call_operand.vmem [shape: f32[2,192,128], index: 4, kind: output, shape index: {}]  }
   0x1   :  { %s1684_s17 = smov 0  }
   0x2 LB: > { %s26_s18 = sadd.s32 1, %s1649_s16  ;;  %p1256_p0 = scmp.ge.s32.totalorder %s1653_s17, 1  ;;  %s1653_s17 = sphi %s1684_s17, %s14_s17   ;;  %s1649_s16 = sphi %s1682_s16, %s2084_s16   ;;  %s1645_s15 = sphi %s1680_s15, %s2083_s15  }
   0x3   : > { %p28_p1 = scmp.ge.s32.totalorder %s26_s18, 2  ;;  %p196_p2 = scmp.lt.s32.totalorder %s1653_s17, 3 }
   0x5   : > { %s2086_s18 = smov (%p28_p1, %s26_s18), 0  ;;  %p197_p3 = pnand %p1256_p0, %p196_p2 }
   0x6   : > { %p236_p4 = scmp.lt.s32.totalorder (!%p197_p3), %s1645_s15, 1  ;;  %v1701_v0 = vld [vmem:[%s2081_s3] sm:$0xff] (!%p197_p3)   ;;  %vm329_vm0 = vcmask (!%p197_p3), 523264   ;;  %v1743_v30 = vld [vmem:[%s2081_s3 + $0x8] sm:$0xff] (!%p197_p3)   ;;  %v1764_v40 = vld [vmem:[%s2081_s3 + $0x10] sm:$0xff] (!%p197_p3)  }
   0x7   : > { %200 = sbr.rel (%p197_p3) target bundleno = 330 (0x14a), region = 36  ;;  %v1706_v1 = vld [vmem:[%s2080_s2] sm:$0xff] (!%p197_p3)   ;;  %1406 = vmatprep.mubr.msk.bf16.mxu1 (!%p197_p3), %vm329_vm0, %v1701_v0  ;;  %v1748_v31 = vld [vmem:[%s2080_s2 + $0x8] sm:$0xff] (!%p197_p3)   ;;  %v1769_v41 = vld [vmem:[%s2080_s2 + $0x10] sm:$0xff] (!%p197_p3)  }
   0x8   : > { %1422 = vmatprep.mubr.msk.bf16.mxu0 (!%p197_p3), %vm329_vm0, %v1706_v1  ;;  %v1794_v48 = vld [vmem:[%s2081_s3 + $0x18] sm:$0xff] (!%p197_p3)  }
   0x9   : > { %v1799_v49 = vld [vmem:[%s2080_s2 + $0x18] sm:$0xff] (!%p197_p3)  }
   0xe   : > { %s2088_s15 = smov (!%p236_p4, %s1645_s15), 1 }
   0xf   : > { %s1324_s23 = sshll.u32 %s2088_s15, 6  ;;  %s1325_s27 = sshll.u32 %s2088_s15, 7 }
  0x10   : > { %s243_s26 = scalar_lea.vmem %s2078_s0, %s1324_s23  ;;  %s1722_s30 = scalar_lea.vmem %s2079_s1, %s1325_s27 }
  0x11   : > { %v277_v2 = vld [vmem:[%s243_s26] sm:$0xff]  ;;  %v278_v3 = vld [vmem:[%s243_s26 + $0x8] sm:$0xff]  ;;  %v279_v4 = vld [vmem:[%s243_s26 + $0x10] sm:$0xff]  ;;  %s1598_s21 = smul.u32 192, %s2088_s15 }
  0x12   : > { %v285_v5 = vpack.c.bf16 %v278_v3, %v277_v2  ;;  %v280_v6 = vld [vmem:[%s243_s26 + $0x18] sm:$0xff]  ;;  %v281_v8 = vld [vmem:[%s243_s26 + $0x20] sm:$0xff]  ;;  %v282_v9 = vld [vmem:[%s243_s26 + $0x28] sm:$0xff] }
  0x13   : > { %v286_v7 = vpack.c.bf16 %v280_v6, %v279_v4  ;;  %v283_v10 = vld [vmem:[%s243_s26 + $0x30] sm:$0xff]  ;;  %v287_v11 = vpack.c.bf16 %v282_v9, %v281_v8  ;;  %v284_v12 = vld [vmem:[%s243_s26 + $0x38] sm:$0xff]  ;;  %v1725_v18 = vld [vmem:[%s1722_s30] sm:$0xff]  ;;  %s1988_s24 = scalar_lea.vmem %s2082_s4, %s1598_s21 }
  0x14   : > { %1398 = vmatprep.subr.bf16.mxu1 %v285_v5  ;;  %1414 = vmatprep.subr.bf16.mxu0 %v285_v5  ;;  %v289_v13 = vunpack.c.l.bf16 %v285_v5  ;;  %v290_v14 = vunpack.c.h.bf16 %v285_v5  ;;  %v288_v15 = vpack.c.bf16 %v284_v12, %v283_v10  ;;  %v1728_v19 = vld [vmem:[%s1722_s30 + $0x8] sm:$0xff]  ;;  %v1735_v27 = vld [vmem:[%s1722_s30 + $0x10] sm:$0xff]  ;;  %v1738_v28 = vld [vmem:[%s1722_s30 + $0x18] sm:$0xff] }
  0x15   : > { %1399 = vmatpush3.bf16.msra.mxu1 %v285_v5  ;;  %1415 = vmatpush3.bf16.msra.mxu0 %v285_v5  ;;  %v291_v20 = vunpack.c.l.bf16 %v286_v7  ;;  %v292_v21 = vunpack.c.h.bf16 %v286_v7  ;;  %v1732_v22 = vpack.c.bf16 %v1728_v19, %v1725_v18  ;;  %v293_v23 = vunpack.c.l.bf16 %v287_v11  ;;  %v1756_v37 = vld [vmem:[%s1722_s30 + $0x20] sm:$0xff]  ;;  %v1759_v38 = vld [vmem:[%s1722_s30 + $0x28] sm:$0xff]  ;;  %v1786_v46 = vld [vmem:[%s1722_s30 + $0x30] sm:$0xff] }
  0x16   : > { %1400 = vmatprep.subr.bf16.mxu1 %v286_v7  ;;  %1416 = vmatprep.subr.bf16.mxu0 %v286_v7  ;;  %v297_v16 = vsub.f32 %v277_v2, %v289_v13  ;;  %v298_v17 = vsub.f32 %v278_v3, %v290_v14  ;;  %v294_v29 = vunpack.c.h.bf16 %v287_v11  ;;  %v1752_v32 = vpack.c.bf16 %v1738_v28, %v1735_v27  ;;  %v1789_v47 = vld [vmem:[%s1722_s30 + $0x38] sm:$0xff]  ;;  %v1808_v52 = vld [vmem:[%s1722_s30 + $0x40] sm:$0xff]  ;;  %v1811_v53 = vld [vmem:[%s1722_s30 + $0x48] sm:$0xff] }
  0x17   : > { %v299_v25 = vsub.f32 %v279_v4, %v291_v20  ;;  %v300_v26 = vsub.f32 %v280_v6, %v292_v21  ;;  %v295_v33 = vunpack.c.l.bf16 %v288_v15  ;;  %v301_v35 = vsub.f32 %v281_v8, %v293_v23  ;;  %v1828_v55 = vld [vmem:[%s1722_s30 + $0x50] sm:$0xff]  ;;  %v1831_v56 = vld [vmem:[%s1722_s30 + $0x58] sm:$0xff]  ;;  %v1841_v58 = vld [vmem:[%s1722_s30 + $0x60] sm:$0xff] }
  0x18   : > { %v305_v24 = vpack.c.bf16 %v298_v17, %v297_v16  ;;  %v302_v36 = vsub.f32 %v282_v9, %v294_v29  ;;  %v296_v39 = vunpack.c.h.bf16 %v288_v15  ;;  %v1778_v42 = vpack.c.bf16 %v1759_v38, %v1756_v37  ;;  %v1844_v59 = vld [vmem:[%s1722_s30 + $0x68] sm:$0xff]  ;;  %v1865_v63 = vld [vmem:[%s1722_s30 + $0x70] sm:$0xff]  ;;  %v1868_v2 = vld [vmem:[%s1722_s30 + $0x78] sm:$0xff] }
  0x19   : > { %1401 = vmatpush3.bf16.msra.mxu1 %v286_v7  ;;  %1417 = vmatpush3.bf16.msra.mxu0 %v286_v7  ;;  %v306_v34 = vpack.c.bf16 %v300_v26, %v299_v25  ;;  %v303_v44 = vsub.f32 %v283_v10, %v295_v33  ;;  %v1805_v51 = vpack.c.bf16 %v1789_v47, %v1786_v46  ;;  %v589_v60 = vunpack.c.l.bf16 %v1732_v22 }
  0x1a   : > { %1402 = vmatprep.subr.bf16.mxu1 %v287_v11  ;;  %1418 = vmatprep.subr.bf16.mxu0 %v287_v11  ;;  %v307_v43 = vpack.c.bf16 %v302_v36, %v301_v35  ;;  %v304_v45 = vsub.f32 %v284_v12, %v296_v39  ;;  %v1821_v54 = vpack.c.bf16 %v1811_v53, %v1808_v52  ;;  %v590_v62 = vunpack.c.h.bf16 %v1732_v22 }
  0x1b   : > { %v1838_v57 = vpack.c.bf16 %v1831_v56, %v1828_v55  ;;  %v1857_v61 = vpack.c.bf16 %v1844_v59, %v1841_v58  ;;  %v597_v3 = vsub.f32 %v1725_v18, %v589_v60  ;;  %v1877_v4 = vpack.c.bf16 %v1868_v2, %v1865_v63 }
  0x1c   : > { %v308_v50 = vpack.c.bf16 %v304_v45, %v303_v44  ;;  %v598_v5 = vsub.f32 %v1728_v19, %v590_v62  ;;  %v591_v6 = vunpack.c.l.bf16 %v1752_v32  ;;  %v592_v7 = vunpack.c.h.bf16 %v1752_v32 }
  0x1d   : > { %1403 = vmatpush3.bf16.msra.mxu1 %v287_v11  ;;  %1419 = vmatpush3.bf16.msra.mxu0 %v287_v11  ;;  %v593_v8 = vunpack.c.l.bf16 %v1778_v42  ;;  %v594_v12 = vunpack.c.h.bf16 %v1778_v42  ;;  %v595_v13 = vunpack.c.l.bf16 %v1805_v51  ;;  %v596_v17 = vunpack.c.h.bf16 %v1805_v51 }
  0x1e   : > { %1404 = vmatprep.subr.bf16.mxu1 %v288_v15  ;;  %1420 = vmatprep.subr.bf16.mxu0 %v288_v15  ;;  %v605_v9 = vpack.c.bf16 %v598_v5, %v597_v3  ;;  %v599_v10 = vsub.f32 %v1735_v27, %v591_v6  ;;  %v600_v11 = vsub.f32 %v1738_v28, %v592_v7  ;;  %v833_v21 = vunpack.c.h.bf16 %v1821_v54 }
  0x1f   : > { %v602_v16 = vsub.f32 %v1759_v38, %v594_v12  ;;  %v603_v19 = vsub.f32 %v1786_v46, %v595_v13  ;;  %v604_v20 = vsub.f32 %v1789_v47, %v596_v17  ;;  %v834_v25 = vunpack.c.l.bf16 %v1838_v57 }
  0x20   : > { %v606_v14 = vpack.c.bf16 %v600_v11, %v599_v10  ;;  %v835_v26 = vunpack.c.h.bf16 %v1838_v57  ;;  %v836_v27 = vunpack.c.l.bf16 %v1857_v61  ;;  %v838_v33 = vunpack.c.l.bf16 %v1877_v4 }
  0x21   : > { %1405 = vmatpush3.bf16.msra.mxu1 %v288_v15  ;;  %1421 = vmatpush3.bf16.msra.mxu0 %v288_v15  ;;  %v601_v15 = vsub.f32 %v1756_v37, %v593_v8  ;;  %v608_v23 = vpack.c.bf16 %v604_v20, %v603_v19  ;;  %v842_v29 = vsub.f32 %v1828_v55, %v834_v25  ;;  %v839_v37 = vunpack.c.h.bf16 %v1877_v4 }
  0x22   : > { %1430 = vmatprep.subr.bf16.mxu0 %v305_v24  ;;  %1446 = vmatprep.subr.bf16.mxu1 %v1732_v22  ;;  %v844_v35 = vsub.f32 %v1841_v58, %v836_v27  ;;  %v846_v39 = vsub.f32 %v1865_v63, %v838_v33 }
  0x23   : > { %v607_v18 = vpack.c.bf16 %v602_v16, %v601_v15 }
  0x24   : > { %1407 = vmatmul.mubr.msk.bf16.vlgmr.msra.gmra.mrb[0].mxu1 %vm329_vm0, %v1743_v30  ;;  %1423 = vmatmul.mubr.msk.bf16.vlgmr.msra.gmra.mrb[0].mxu0 %vm329_vm0, %v1748_v31 }
  0x25   : > { %1431 = vmatpush3.bf16.msra.mxu0 %v305_v24  ;;  %1447 = vmatpush3.bf16.msra.mxu1 %v1732_v22  ;;  %v841_v24 = vsub.f32 %v1811_v53, %v833_v21 }
  0x26   : > { %1432 = vmatprep.subr.bf16.mxu0 %v306_v34  ;;  %1448 = vmatprep.subr.bf16.mxu1 %v1752_v32 }
  0x27   : > { %1410 = vmatprep.mubr.msk.bf16.mxu1 %vm329_vm0, %v1764_v40  ;;  %1426 = vmatprep.mubr.msk.bf16.mxu0 %vm329_vm0, %v1769_v41 }
  0x29   : > { %1433 = vmatpush3.bf16.msra.mxu0 %v306_v34  ;;  %1449 = vmatpush3.bf16.msra.mxu1 %v1752_v32 }
  0x2a   : > { %1434 = vmatprep.subr.bf16.mxu0 %v307_v43  ;;  %1450 = vmatprep.subr.bf16.mxu1 %v1778_v42 }
  0x2c   : > { %1411 = vmatmul.mubr.msk.bf16.gmra.mrb[4].mxu1 %vm329_vm0, %v1794_v48  ;;  %1427 = vmatmul.mubr.msk.bf16.gmra.mrb[4].mxu0 %vm329_vm0, %v1799_v49 }
  0x2d   : > { %1435 = vmatpush3.bf16.msra.mxu0 %v307_v43  ;;  %1451 = vmatpush3.bf16.msra.mxu1 %v1778_v42 }
  0x2e   : > { %1436 = vmatprep.subr.bf16.mxu0 %v308_v50  ;;  %1452 = vmatprep.subr.bf16.mxu1 %v1805_v51 }
  0x2f   : > { %1438 = vmatprep.mubr.msk.bf16.mxu0 %vm329_vm0, %v1706_v1  ;;  %1454 = vmatprep.mubr.msk.bf16.mxu1 %vm329_vm0, %v1701_v0 }
  0x31   : > { %1437 = vmatpush3.bf16.msra.mxu0 %v308_v50  ;;  %1453 = vmatpush3.bf16.msra.mxu1 %v1805_v51 }
  0x32   : > { %1462 = vmatprep.subr.bf16.mxu1 %v1732_v22  ;;  %1494 = vmatprep.subr.bf16.mxu0 %v1821_v54 }
  0x34   : > { %1439 = vmatmul.mubr.msk.bf16.vlgmr.msra.gmra.mrb[0].mxu0 %vm329_vm0, %v1748_v31  ;;  %1455 = vmatmul.mubr.msk.bf16.vlgmr.msra.gmra.mrb[8].mxu1 %vm329_vm0, %v1743_v30 }
  0x35   : > { %1463 = vmatpush3.bf16.msra.mxu1 %v1732_v22  ;;  %1495 = vmatpush3.bf16.msra.mxu0 %v1821_v54 }
  0x36   : > { %1464 = vmatprep.subr.bf16.mxu1 %v1752_v32  ;;  %1496 = vmatprep.subr.bf16.mxu0 %v1838_v57 }
  0x37   : > { %1442 = vmatprep.mubr.msk.bf16.mxu0 %vm329_vm0, %v1769_v41  ;;  %1458 = vmatprep.mubr.msk.bf16.mxu1 %vm329_vm0, %v1764_v40 }
  0x39   : > { %1465 = vmatpush3.bf16.msra.mxu1 %v1752_v32  ;;  %1497 = vmatpush3.bf16.msra.mxu0 %v1838_v57  ;;  %v837_v32 = vunpack.c.h.bf16 %v1857_v61 }
  0x3a   : > { %1466 = vmatprep.subr.bf16.mxu1 %v1778_v42  ;;  %1498 = vmatprep.subr.bf16.mxu0 %v1857_v61 }
  0x3b   : > { %v845_v36 = vsub.f32 %v1844_v59, %v837_v32 }
  0x3c   : > { %1443 = vmatmul.mubr.msk.bf16.gmra.mrb[4].mxu0 %vm329_vm0, %v1799_v49  ;;  %1459 = vmatmul.mubr.msk.bf16.gmra.mrb[12].mxu1 %vm329_vm0, %v1794_v48 }
  0x3d   : > { %1467 = vmatpush3.bf16.msra.mxu1 %v1778_v42  ;;  %1499 = vmatpush3.bf16.msra.mxu0 %v1857_v61  ;;  %v850_v38 = vpack.c.bf16 %v845_v36, %v844_v35 }
  0x3e   : > { %1468 = vmatprep.subr.bf16.mxu1 %v1805_v51  ;;  %1500 = vmatprep.subr.bf16.mxu0 %v1877_v4 }
  0x3f   : > { %1470 = vmatprep.mubr.msk.bf16.mxu1 %vm329_vm0, %v1706_v1  ;;  %1502 = vmatprep.mubr.msk.bf16.mxu0 %vm329_vm0, %v1701_v0  ;;  %v832_v0 = vunpack.c.l.bf16 %v1821_v54 }
  0x41   : > { %1469 = vmatpush3.bf16.msra.mxu1 %v1805_v51  ;;  %1501 = vmatpush3.bf16.msra.mxu0 %v1877_v4  ;;  %v840_v22 = vsub.f32 %v1808_v52, %v832_v0 }
  0x42   : > { %1478 = vmatprep.subr.bf16.mxu1 %v605_v9  ;;  %1510 = vmatprep.subr.bf16.mxu0 %v1821_v54 }
  0x43   : > { %v848_v28 = vpack.c.bf16 %v841_v24, %v840_v22 }
  0x44   : > { %1471 = vmatmul.mubr.msk.bf16.vlgmr.msra.gmra.mrb[8].mxu1 %vm329_vm0, %v1748_v31  ;;  %1503 = vmatmul.mubr.msk.bf16.vlgmr.msra.gmra.mrb[8].mxu0 %vm329_vm0, %v1743_v30  ;;  %v843_v30 = vsub.f32 %v1831_v56, %v835_v26 }
  0x45   : > { %1479 = vmatpush3.bf16.msra.mxu1 %v605_v9  ;;  %1511 = vmatpush3.bf16.msra.mxu0 %v1821_v54 }
  0x46   : > { %1480 = vmatprep.subr.bf16.mxu1 %v606_v14  ;;  %1512 = vmatprep.subr.bf16.mxu0 %v1838_v57  ;;  %v849_v34 = vpack.c.bf16 %v843_v30, %v842_v29 }
  0x47   : > { %1474 = vmatprep.mubr.msk.bf16.mxu1 %vm329_vm0, %v1769_v41  ;;  %1506 = vmatprep.mubr.msk.bf16.mxu0 %vm329_vm0, %v1764_v40  ;;  %v847_v40 = vsub.f32 %v1868_v2, %v839_v37 }
  0x49   : > { %1481 = vmatpush3.bf16.msra.mxu1 %v606_v14  ;;  %1513 = vmatpush3.bf16.msra.mxu0 %v1838_v57  ;;  %v851_v42 = vpack.c.bf16 %v847_v40, %v846_v39 }
  0x4a   : > { %1482 = vmatprep.subr.bf16.mxu1 %v607_v18  ;;  %1514 = vmatprep.subr.bf16.mxu0 %v1857_v61 }
  0x4c   : > { %1475 = vmatmul.mubr.msk.bf16.gmra.mrb[12].mxu1 %vm329_vm0, %v1799_v49  ;;  %1507 = vmatmul.mubr.msk.bf16.gmra.mrb[12].mxu0 %vm329_vm0, %v1794_v48 }
  0x4d   : > { %1483 = vmatpush3.bf16.msra.mxu1 %v607_v18  ;;  %1515 = vmatpush3.bf16.msra.mxu0 %v1857_v61 }
  0x4e   : > { %1484 = vmatprep.subr.bf16.mxu1 %v608_v23  ;;  %1516 = vmatprep.subr.bf16.mxu0 %v1877_v4 }
  0x4f   : > { %1486 = vmatprep.mubr.msk.bf16.mxu1 %vm329_vm0, %v1706_v1  ;;  %1518 = vmatprep.mubr.msk.bf16.mxu0 %vm329_vm0, %v1706_v1 }
  0x51   : > { %1485 = vmatpush3.bf16.msra.mxu1 %v608_v23  ;;  %1517 = vmatpush3.bf16.msra.mxu0 %v1877_v4 }
  0x52   : > { %1526 = vmatprep.subr.bf16.mxu0 %v848_v28  ;;  %1542 = vmatprep.subr.bf16.mxu1 %v848_v28 }
  0x54   : > { %1487 = vmatmul.mubr.msk.bf16.vlgmr.msra.gmra.mrb[8].mxu1 %vm329_vm0, %v1748_v31  ;;  %1519 = vmatmul.mubr.msk.bf16.vlgmr.msra.gmra.mrb[8].mxu0 %vm329_vm0, %v1748_v31 }
  0x55   : > { %1527 = vmatpush3.bf16.msra.mxu0 %v848_v28  ;;  %1546 = vmatpush3.bf16.msra.mxu1 %v848_v28 }
  0x56   : > { %1528 = vmatprep.subr.bf16.mxu0 %v849_v34  ;;  %1543 = vmatprep.subr.bf16.mxu1 %v849_v34 }
  0x57   : > { %1490 = vmatprep.mubr.msk.bf16.mxu1 %vm329_vm0, %v1769_v41  ;;  %1522 = vmatprep.mubr.msk.bf16.mxu0 %vm329_vm0, %v1769_v41 }
  0x59   : > { %1529 = vmatpush3.bf16.msra.mxu0 %v849_v34  ;;  %1547 = vmatpush3.bf16.msra.mxu1 %v849_v34 }
  0x5a   : > { %1530 = vmatprep.subr.bf16.mxu0 %v850_v38  ;;  %1544 = vmatprep.subr.bf16.mxu1 %v850_v38 }
  0x5c   : > { %1491 = vmatmul.mubr.msk.bf16.gmra.mrb[12].mxu1 %vm329_vm0, %v1799_v49  ;;  %1523 = vmatmul.mubr.msk.bf16.gmra.mrb[12].mxu0 %vm329_vm0, %v1799_v49 }
  0x5d   : > { %1531 = vmatpush3.bf16.msra.mxu0 %v850_v38  ;;  %1548 = vmatpush3.bf16.msra.mxu1 %v850_v38 }
  0x5e   : > { %1532 = vmatprep.subr.bf16.mxu0 %v851_v42  ;;  %1545 = vmatprep.subr.bf16.mxu1 %v851_v42 }
  0x5f   : > { %1534 = vmatprep.mubr.msk.bf16.mxu0 %vm329_vm0, %v1706_v1  ;;  %1538 = vmatprep.mubr.msk.bf16.mxu1 %vm329_vm0, %v1769_v41 }
  0x61   : > { %1533 = vmatpush3.bf16.msra.mxu0 %v851_v42  ;;  %1549 = vmatpush3.bf16.msra.mxu1 %v851_v42 }
  0x64   : > { %1535 = vmatmul.mubr.msk.bf16.vlgmr.msra.gmra.mrb[8].mxu0 %vm329_vm0, %v1748_v31  ;;  %1539 = vmatmul.mubr.msk.bf16.vlgmr.msra.gmra.mrb[16].mxu1 %vm329_vm0, %v1799_v49 }
  0xf7   : > { %v1408_v43 = vpop.f32.mrb[0].mxu1 }
  0xf8   : > { %v376_v44 = vpop.f32.mrb[1].mxu1 }
  0xf9   : > { %v1409_v45 = vpop.f32.mrb[2].mxu1 }
  0xfa   : > { %v379_v46 = vpop.f32.mrb[3].mxu1 }
  0xff   : > { %v1412_v47 = vpop.f32.mrb[4].mxu1 }
 0x100   : > { %v392_v48 = vpop.f32.mrb[5].mxu1 }
 0x101   : > { %v1413_v50 = vpop.f32.mrb[6].mxu1 }
 0x102   : > { %v395_v51 = vpop.f32.mrb[7].mxu1 }
 0x107   : > { %v1440_v1 = vpop.f32.mrb[0].mxu0 }
 0x108   : > { %v1966_v52 = vadd.f32 %v1440_v1, %v1408_v43  ;;  %v538_v41 = vpop.f32.mrb[1].mxu0 }
 0x109   : > { %v1968_v53 = vadd.f32 %v538_v41, %v376_v44  ;;  %v1441_v54 = vpop.f32.mrb[2].mxu0 }
 0x10a   : > { %v1970_v31 = vadd.f32 %v1441_v54, %v1409_v45  ;;  %v541_v55 = vpop.f32.mrb[3].mxu0 }
 0x10b   : > { %v1972_v49 = vadd.f32 %v541_v55, %v379_v46 }
 0x10f   : > { %v1444_v56 = vpop.f32.mrb[4].mxu0 }
 0x110   : > { %v1974_v57 = vadd.f32 %v1444_v56, %v1412_v47  ;;  %v554_v58 = vpop.f32.mrb[5].mxu0 }
 0x111   : > { %v1976_v59 = vadd.f32 %v554_v58, %v392_v48  ;;  %v1445_v60 = vpop.f32.mrb[6].mxu0 }
 0x112   : > { %v1978_v61 = vadd.f32 %v1445_v60, %v1413_v50  ;;  %v557_v62 = vpop.f32.mrb[7].mxu0 }
 0x113   : > { %v1980_v63 = vadd.f32 %v557_v62, %v395_v51 }
 0x127   : > { %v1488_v2 = vpop.f32.mrb[8].mxu1 }
 0x128   : > { %v1296_v3 = vadd.f32 -0.5, %v1488_v2  ;;  %v773_v4 = vpop.f32.mrb[9].mxu1 }
 0x129   : > { %v1294_v5 = vadd.f32 -0.5, %v773_v4  ;;  %v1489_v6 = vpop.f32.mrb[10].mxu1 }
 0x12a   : > { %v1983_v7 = vmul.f32 0.3441363, %v1296_v3  ;;  %v1129_v8 = vmul.f32 1.772, %v1296_v3  ;;  %v1297_v9 = vadd.f32 -0.5, %v1489_v6  ;;  %v776_v10 = vpop.f32.mrb[11].mxu1 }
 0x12b   : > { %v1990_v11 = vmul.f32 0.3441363, %v1294_v5  ;;  %v1127_v12 = vmul.f32 1.772, %v1294_v5  ;;  %v1295_v13 = vadd.f32 -0.5, %v776_v10 }
 0x12c   : > { %v1097_v14 = vsub.f32 %v1966_v52, %v1983_v7  ;;  %v1137_v15 = vadd.f32 %v1966_v52, %v1129_v8  ;;  %v1995_v16 = vmul.f32 0.3441363, %v1297_v9  ;;  %v1130_v17 = vmul.f32 1.772, %v1297_v9 }
 0x12d   : > { %v1095_v0 = vsub.f32 %v1968_v53, %v1990_v11  ;;  %v1135_v18 = vadd.f32 %v1968_v53, %v1127_v12  ;;  %v2000_v19 = vmul.f32 0.3441363, %v1295_v13  ;;  %v1128_v20 = vmul.f32 1.772, %v1295_v13 }
 0x12e   : > { %1145 = vst [vmem:[%s1988_s24 + $0x90] sm:$0xff] %v1137_v15  ;;  %v1098_v21 = vsub.f32 %v1970_v31, %v1995_v16  ;;  %v1138_v22 = vadd.f32 %v1970_v31, %v1130_v17 }
 0x12f   : > { %1143 = vst [vmem:[%s1988_s24 + $0x80] sm:$0xff] %v1135_v18  ;;  %v1096_v23 = vsub.f32 %v1972_v49, %v2000_v19  ;;  %v1136_v24 = vadd.f32 %v1972_v49, %v1128_v20  ;;  %v1492_v25 = vpop.f32.mrb[12].mxu1  ;;  %v1524_v26 = vpop.f32.mrb[12].mxu0 }
 0x130   : > { %1146 = vst [vmem:[%s1988_s24 + $0x98] sm:$0xff] %v1138_v22  ;;  %v1300_v27 = vadd.f32 -0.5, %v1492_v25  ;;  %v789_v28 = vpop.f32.mrb[13].mxu1  ;;  %v967_v29 = vpop.f32.mrb[13].mxu0 }
 0x131   : > { %1144 = vst [vmem:[%s1988_s24 + $0x88] sm:$0xff] %v1136_v24  ;;  %v1298_v30 = vadd.f32 -0.5, %v789_v28  ;;  %v1493_v32 = vpop.f32.mrb[14].mxu1  ;;  %v1525_v33 = vpop.f32.mrb[14].mxu0 }
 0x132   : > { %v1093_v34 = vmul.f32 0.3441363, %v1300_v27  ;;  %v1133_v35 = vmul.f32 1.772, %v1300_v27  ;;  %v1301_v36 = vadd.f32 -0.5, %v1493_v32  ;;  %v792_v37 = vpop.f32.mrb[15].mxu1 }
 0x133   : > { %v1091_v38 = vmul.f32 0.3441363, %v1298_v30  ;;  %v1131_v39 = vmul.f32 1.772, %v1298_v30  ;;  %v1299_v40 = vadd.f32 -0.5, %v792_v37  ;;  %v970_v42 = vpop.f32.mrb[15].mxu0 }
 0x134   : > { %v1101_v43 = vsub.f32 %v1974_v57, %v1093_v34  ;;  %v1141_v44 = vadd.f32 %v1974_v57, %v1133_v35  ;;  %v2014_v45 = vmul.f32 0.3441363, %v1301_v36  ;;  %v1134_v46 = vmul.f32 1.772, %v1301_v36 }
 0x135   : > { %v1099_v47 = vsub.f32 %v1976_v59, %v1091_v38  ;;  %v1139_v48 = vadd.f32 %v1976_v59, %v1131_v39  ;;  %v2018_v50 = vmul.f32 0.3441363, %v1299_v40  ;;  %v1132_v51 = vmul.f32 1.772, %v1299_v40 }
 0x136   : > { %1149 = vst [vmem:[%s1988_s24 + $0xb0] sm:$0xff] %v1141_v44  ;;  %v1102_v1 = vsub.f32 %v1978_v61, %v2014_v45  ;;  %v1142_v41 = vadd.f32 %v1978_v61, %v1134_v46 }
 0x137   : > { %1147 = vst [vmem:[%s1988_s24 + $0xa0] sm:$0xff] %v1139_v48  ;;  %v1100_v54 = vsub.f32 %v1980_v63, %v2018_v50  ;;  %v1140_v55 = vadd.f32 %v1980_v63, %v1132_v51  ;;  %v1536_v56 = vpop.f32.mrb[8].mxu0  ;;  %v1540_v58 = vpop.f32.mrb[16].mxu1 }
 0x138   : > { %1150 = vst [vmem:[%s1988_s24 + $0xb8] sm:$0xff] %v1142_v41  ;;  %v1316_v60 = vadd.f32 -0.5, %v1536_v56  ;;  %v1558_v62 = vadd.f32 %v1540_v58, %v1524_v26  ;;  %v1016_v2 = vpop.f32.mrb[9].mxu0  ;;  %v1032_v3 = vpop.f32.mrb[17].mxu1 }
 0x139   : > { %1148 = vst [vmem:[%s1988_s24 + $0xa8] sm:$0xff] %v1140_v55  ;;  %v1314_v4 = vadd.f32 -0.5, %v1016_v2  ;;  %v1559_v5 = vadd.f32 %v1032_v3, %v967_v29  ;;  %v1537_v6 = vpop.f32.mrb[10].mxu0  ;;  %v1541_v8 = vpop.f32.mrb[18].mxu1 }
 0x13a   : > { %v1065_v9 = vmul.f32 1.402, %v1316_v60  ;;  %v1105_v10 = vmul.f32 0.7141363, %v1316_v60  ;;  %v1320_v12 = vadd.f32 -0.5, %v1558_v62  ;;  %v1317_v13 = vadd.f32 -0.5, %v1537_v6 }
 0x13b   : > { %v1063_v15 = vmul.f32 1.402, %v1314_v4  ;;  %v1103_v17 = vmul.f32 0.7141363, %v1314_v4  ;;  %v1318_v18 = vadd.f32 -0.5, %v1559_v5  ;;  %v1560_v20 = vadd.f32 %v1541_v8, %v1525_v33  ;;  %v1019_v22 = vpop.f32.mrb[11].mxu0 }
 0x13c   : > { %v1073_v24 = vadd.f32 %v1966_v52, %v1065_v9  ;;  %v1113_v25 = vsub.f32 %v1097_v14, %v1105_v10  ;;  %v1069_v26 = vmul.f32 1.402, %v1320_v12  ;;  %v1109_v27 = vmul.f32 0.7141363, %v1320_v12  ;;  %v1035_v28 = vpop.f32.mrb[19].mxu1 }
 0x13d   : > { %v1071_v29 = vadd.f32 %v1968_v53, %v1063_v15  ;;  %v1111_v30 = vsub.f32 %v1095_v0, %v1103_v17  ;;  %v1067_v32 = vmul.f32 1.402, %v1318_v18  ;;  %v1107_v33 = vmul.f32 0.7141363, %v1318_v18 }
 0x13e   : > { %1081 = vst [vmem:[%s1988_s24 + $0x10] sm:$0xff] %v1073_v24  ;;  %1121 = vst [vmem:[%s1988_s24 + $0x50] sm:$0xff] %v1113_v25  ;;  %v1077_v52 = vadd.f32 %v1974_v57, %v1069_v26  ;;  %v1117_v7 = vsub.f32 %v1101_v43, %v1109_v27  ;;  %v1066_v14 = vmul.f32 1.402, %v1317_v13  ;;  %v1106_v34 = vmul.f32 0.7141363, %v1317_v13 }
 0x13f   : > { %1079 = vst [vmem:[%s1988_s24] sm:$0xff] %v1071_v29  ;;  %1119 = vst [vmem:[%s1988_s24 + $0x40] sm:$0xff] %v1111_v30  ;;  %v1075_v53 = vadd.f32 %v1976_v59, %v1067_v32  ;;  %v1115_v11 = vsub.f32 %v1099_v47, %v1107_v33  ;;  %v1321_v0 = vadd.f32 -0.5, %v1560_v20  ;;  %v1315_v35 = vadd.f32 -0.5, %v1019_v22 }
 0x140   : > { %1085 = vst [vmem:[%s1988_s24 + $0x30] sm:$0xff] %v1077_v52  ;;  %1125 = vst [vmem:[%s1988_s24 + $0x70] sm:$0xff] %v1117_v7  ;;  %v1074_v36 = vadd.f32 %v1970_v31, %v1066_v14  ;;  %v1114_v57 = vsub.f32 %v1098_v21, %v1106_v34  ;;  %v1561_v37 = vadd.f32 %v1035_v28, %v970_v42 }
 0x141   : > { %1083 = vst [vmem:[%s1988_s24 + $0x20] sm:$0xff] %v1075_v53  ;;  %1123 = vst [vmem:[%s1988_s24 + $0x60] sm:$0xff] %v1115_v11  ;;  %v1070_v38 = vmul.f32 1.402, %v1321_v0  ;;  %v1110_v59 = vmul.f32 0.7141363, %v1321_v0 }
 0x142   : > { %v1064_v39 = vmul.f32 1.402, %v1315_v35  ;;  %1082 = vst [vmem:[%s1988_s24 + $0x18] sm:$0xff] %v1074_v36  ;;  %1122 = vst [vmem:[%s1988_s24 + $0x58] sm:$0xff] %v1114_v57  ;;  %v1104_v40 = vmul.f32 0.7141363, %v1315_v35 }
 0x143   : > { %v1319_v43 = vadd.f32 -0.5, %v1561_v37  ;;  %v1078_v44 = vadd.f32 %v1978_v61, %v1070_v38  ;;  %v1118_v31 = vsub.f32 %v1102_v1, %v1110_v59 }
 0x144   : > { %v1072_v16 = vadd.f32 %v1972_v49, %v1064_v39  ;;  %v1112_v21 = vsub.f32 %v1096_v23, %v1104_v40 }
 0x145   : > { %v1068_v42 = vmul.f32 1.402, %v1319_v43  ;;  %v1108_v45 = vmul.f32 0.7141363, %v1319_v43  ;;  %1086 = vst [vmem:[%s1988_s24 + $0x38] sm:$0xff] %v1078_v44  ;;  %1126 = vst [vmem:[%s1988_s24 + $0x78] sm:$0xff] %v1118_v31 }
 0x146   : > { %1080 = vst [vmem:[%s1988_s24 + $0x8] sm:$0xff] %v1072_v16  ;;  %1120 = vst [vmem:[%s1988_s24 + $0x48] sm:$0xff] %v1112_v21 }
 0x147   : > { %v1076_v46 = vadd.f32 %v1980_v63, %v1068_v42  ;;  %v1116_v47 = vsub.f32 %v1100_v54, %v1108_v45 }
 0x149   : > { %1084 = vst [vmem:[%s1988_s24 + $0x28] sm:$0xff] %v1076_v46  ;;  %1124 = vst [vmem:[%s1988_s24 + $0x68] sm:$0xff] %v1116_v47 }
 0x14a PF: > { %s14_s17 = sadd.s32 1, %s1653_s17   ;;  %s2083_s15 = smov %s1649_s16 }
 0x14b   : > { %p11_p5 = scmp.ge.s32.totalorder %s14_s17, 4   ;;  %s2084_s16 = smov %s2086_s18 }
 0x14d   :  { %13 = sbr.rel (!%p11_p5) target bundleno = 2 (0x2), region = 69 }

</bundles_post_ra>
